<compile_context>
chip_gen: v7x
topology: tpu7x:2x2x1
jax: 0.10.0
libtpu: 0.0.40
codegen_flags: <defaults>
</compile_context>

<pallas_src>
import jax
import jax.numpy as jnp
from jax.experimental import pallas as pl
from jax.experimental.pallas import tpu as pltpu


def _round_up(x, m):
    return (x + m - 1) // m * m


def _vmem_capacity_bytes():
    """Physical VMEM per TensorCore; conservative fallback if query fails."""
    try:
        return int(pltpu.get_tpu_info().vmem_capacity_bytes)
    except Exception:
        return 64 << 20  # v7x-safe lower bound


def ffn_kernel(x_ref, w1_ref, b1_ref, w2_ref, b2_ref, o_ref, acc_ref):
    # x_ref:  (tm, dim_p)  [input dtype, cast in-kernel]
    # w1_ref: (dim_p, tk)  [compute dtype]      b1_ref: (1, tk)   f32
    # w2_ref: (tk, dim_p)  [compute dtype]      b2_ref: (1, dim_p) f32
    # o_ref:  (tm, dim_p)                       acc_ref: (tm, dim_p) f32 scratch
    k = pl.program_id(1)

    @pl.when(k == 0)
    def _init():
        acc_ref[...] = jnp.zeros_like(acc_ref)

    # First matmul (hidden slab) + bias + ReLU; bf16 operands, f32 MXU accumulation.
    xm = x_ref[...].astype(w1_ref.dtype)  # in-kernel cast: cheap VPU work
    h = jnp.dot(xm, w1_ref[...], preferred_element_type=jnp.float32)
    h = jnp.maximum(h + b1_ref[...], 0.0)

    # Second matmul: accumulate this hidden slab's contribution into the f32 scratch.
    acc_ref[...] += jnp.dot(h.astype(w2_ref.dtype), w2_ref[...],
                            preferred_element_type=jnp.float32)

    @pl.when(k == pl.num_programs(1) - 1)
    def _finalize():
        o_ref[...] = (acc_ref[...] + b2_ref[...]).astype(o_ref.dtype)


def prepare_ffn_weights(w1, b1, w2, b2, *, compute_dtype=jnp.bfloat16):
    """One-time weight prep (pad + cast), hoisted out of the per-call path.

    w1: [dim, hidden] (PyTorch weight.T), b1: [hidden], w2: [hidden, dim], b2: [dim].
    Zero-padding is exact: padded x cols meet zero W1 rows; padded hidden cols have
    zero bias -> relu(0)=0 -> zero contribution; padded output cols read back as 0
    and are sliced away.
    """
    dim, hidden = w1.shape
    # 256-alignment feeds full 2x256^2 MXU passes on v6e/v7x; 128 for tiny dims.
    dim_align = 256 if dim > 128 else 128
    dim_p = _round_up(dim, dim_align)
    hidden_p = _round_up(hidden, 128)

    w1p = jnp.pad(w1, ((0, dim_p - dim), (0, hidden_p - hidden))).astype(compute_dtype)
    b1p = jnp.pad(b1, (0, hidden_p - hidden)).astype(jnp.float32).reshape(1, hidden_p)
    w2p = jnp.pad(w2, ((0, hidden_p - hidden), (0, dim_p - dim))).astype(compute_dtype)
    b2p = jnp.pad(b2, (0, dim_p - dim)).astype(jnp.float32).reshape(1, dim_p)

    return dict(w1=w1p, b1=b1p, w2=w2p, b2=b2p,
                dim=dim, hidden=hidden, dim_p=dim_p, hidden_p=hidden_p,
                compute_dtype=jnp.dtype(compute_dtype))


def _choose_tiles(rows, dim_p, hidden_p, x_isz, w_isz, o_isz, vmem_cap,
                  tile_rows=None, tile_hidden=512):
    """Pick (tm, tk, vmem_limit) subject to the per-generation VMEM budget."""
    sublane = max(8, 32 // x_isz, 32 // o_isz)
    budget = max(16 << 20, vmem_cap - (8 << 20))  # leave headroom for compiler scratch

    # tk must divide hidden_p and be a multiple of 128.
    m = hidden_p // 128
    tk_candidates = sorted({128 * d for d in range(1, m + 1) if m % d == 0},
                           reverse=True)

    # Small-weights fast path: if both (double-buffered) weight mats fit in a modest
    # budget, make them block-resident with a single hidden step (DMA'd once total).
    resident_weight_bytes = 2 * 2 * dim_p * hidden_p * w_isz
    if resident_weight_bytes <= (16 << 20):
        tk_target = hidden_p
    else:
        tk_target = max(128, _round_up(tile_hidden, 128))
    tk_idx = 0
    while tk_candidates[tk_idx] > tk_target and tk_idx + 1 < len(tk_candidates):
        tk_idx += 1
    tk = tk_candidates[tk_idx]

    if tile_rows is None:
        # Weights are re-streamed once per row tile -> arithmetic intensity is
        # ~2*tm/itemsize flop per weight byte.  Large tm clears the v6e/v7x ridge
        # (~620-650 flop/B); v7x's 64 MiB VMEM gets the smaller default.
        tile_rows = 768 if vmem_cap >= (96 << 20) else 512
    tm = min(_round_up(max(tile_rows, sublane), sublane), _round_up(rows, sublane))
    # Keep >= 2 row tiles for medium problems so the "parallel" axis can shard
    # across both TensorCores on v7x (without crippling tm for small rows).
    if rows > 2 * 256 and rows < 2 * tm:
        tm = max(256, _round_up((rows + 1) // 2, sublane))

    def tile_bytes(tm_, tk_):
        return (2 * tm_ * dim_p * x_isz       # x tiles (double-buffered)
                + 2 * tm_ * dim_p * o_isz     # out tiles
                + 2 * dim_p * tk_ * w_isz     # W1 slabs
                + 2 * tk_ * dim_p * w_isz     # W2 slabs
                + 2 * 8 * tk_ * 4             # b1 (sublane-padded f32)
                + 2 * 8 * dim_p * 4           # b2
                + tm_ * dim_p * 4)            # f32 accumulator scratch

    # Backoff until the working set fits: shrink tk first (not below 256), then tm,
    # then tk further as a last resort.
    while tile_bytes(tm, tk) > budget:
        if tk > 256 and tk_idx + 1 < len(tk_candidates):
            tk_idx += 1
            tk = tk_candidates[tk_idx]
        elif tm > sublane:
            tm = max(sublane, _round_up(tm // 2, sublane))
        elif tk_idx + 1 < len(tk_candidates):
            tk_idx += 1
            tk = tk_candidates[tk_idx]
        else:
            break

    return tm, tk, int(budget)


def feed_forward(x, params, *, tile_rows=None, tile_hidden=512):
    """x: [B, S, dim]; params from prepare_ffn_weights. Returns [B, S, dim]."""
    B, S, dim = x.shape
    assert dim == params["dim"], "x feature dim does not match prepared weights"
    dim_p, hidden_p = params["dim_p"], params["hidden_p"]
    rows = B * S
    out_dtype = x.dtype

    x_isz = jnp.dtype(x.dtype).itemsize
    w_isz = jnp.dtype(params["compute_dtype"]).itemsize
    o_isz = jnp.dtype(out_dtype).itemsize

    vmem_cap = _vmem_capacity_bytes()
    tm, tk, vmem_limit = _choose_tiles(rows, dim_p, hidden_p, x_isz, w_isz, o_isz,
                                       vmem_cap, tile_rows=tile_rows,
                                       tile_hidden=tile_hidden)
    rows_p = _round_up(rows, tm)

    # Pad x only when required (no bf16 copy of x is ever materialized in HBM).
    x2d = x.reshape(rows, dim)
    if rows_p != rows or dim_p != dim:
        x2d = jnp.pad(x2d, ((0, rows_p - rows), (0, dim_p - dim)))

    n_row_tiles = rows_p // tm
    cost = pl.CostEstimate(
        flops=2 * 2 * rows_p * dim_p * hidden_p,
        transcendentals=0,
        bytes_accessed=(rows_p * dim_p * x_isz                       # x
                        + n_row_tiles * dim_p * hidden_p * w_isz     # W1 (re-streamed)
                        + n_row_tiles * hidden_p * dim_p * w_isz     # W2 (re-streamed)
                        + n_row_tiles * (hidden_p + dim_p) * 4       # biases
                        + rows_p * dim_p * o_isz))                   # out

    # NOTE(v5e): if profiling shows exposed weight DMA, add
    # pipeline_mode=pl.Buffered(3) on the W1/W2 specs (128 MiB VMEM has the room).
    out2d = pl.pallas_call(
        ffn_kernel,
        out_shape=jax.ShapeDtypeStruct((rows_p, dim_p), out_dtype),
        grid_spec=pltpu.PrefetchScalarGridSpec(
            num_scalar_prefetch=0,
            grid=(rows_p // tm, hidden_p // tk),  # rows parallel, hidden reduction last
            in_specs=[
                pl.BlockSpec((tm, dim_p), lambda i, k: (i, 0)),    # x
                pl.BlockSpec((dim_p, tk), lambda i, k: (0, k)),    # W1 slab
                pl.BlockSpec((1, tk), lambda i, k: (0, k)),        # b1 slab
                pl.BlockSpec((tk, dim_p), lambda i, k: (k, 0)),    # W2 slab
                pl.BlockSpec((1, dim_p), lambda i, k: (0, 0)),     # b2
            ],
            out_specs=pl.BlockSpec((tm, dim_p), lambda i, k: (i, 0)),
            scratch_shapes=[pltpu.VMEM((tm, dim_p), jnp.float32)],
        ),
        compiler_params=pltpu.CompilerParams(
            dimension_semantics=("parallel", "arbitrary"),
            vmem_limit_bytes=vmem_limit,
        ),
        cost_estimate=cost,
    )(x2d, params["w1"], params["b1"], params["w2"], params["b2"])

    if rows_p != rows or dim_p != dim:
        out2d = out2d[:rows, :dim]
    return out2d.reshape(B, S, dim)


if __name__ == "__main__":
    # Small shapes implied by the module: (batch, seq, dim) with hidden_dim.
    B, S, dim, hidden = 2, 8, 32, 64

    key = jax.random.PRNGKey(0)
    kx, kw1, kb1, kw2, kb2 = jax.random.split(key, 5)

    x = jax.random.normal(kx, (B, S, dim), dtype=jnp.float32)
    # Deterministic synthetic parameters (shapes match nn.Linear weights^T).
    w1 = jax.random.normal(kw1, (dim, hidden), dtype=jnp.float32) * (1.0 / jnp.sqrt(dim))
    b1 = jax.random.normal(kb1, (hidden,), dtype=jnp.float32) * 0.01
    w2 = jax.random.normal(kw2, (hidden, dim), dtype=jnp.float32) * (1.0 / jnp.sqrt(hidden))
    b2 = jax.random.normal(kb2, (dim,), dtype=jnp.float32) * 0.01

    # Plain-JAX f32 reference (same math; dropout p=0 is identity).
    ref = jnp.maximum(x @ w1 + b1, 0.0) @ w2 + b2

    # Default path: bf16 MXU operands with f32 accumulation.
    params_bf16 = prepare_ffn_weights(w1, b1, w2, b2, compute_dtype=jnp.bfloat16)
    out = feed_forward(x, params_bf16)
    jax.block_until_ready(out)
    assert out.shape == (B, S, dim)
    assert jnp.allclose(out, ref, atol=5e-2, rtol=5e-2), \
        f"bf16 path mismatch: {float(jnp.max(jnp.abs(out - ref)))}"

    # f32-operand path: should match the reference tightly.
    params_f32 = prepare_ffn_weights(w1, b1, w2, b2, compute_dtype=jnp.float32)
    out32 = feed_forward(x, params_f32)
    jax.block_until_ready(out32)
    assert jnp.allclose(out32, ref, atol=1e-5, rtol=1e-5), \
        f"f32 path mismatch: {float(jnp.max(jnp.abs(out32 - ref)))}"

    print("KERNEL_OK")
</pallas_src>

<mosaic_0001>
module attributes {stable_mosaic.version = 11 : i64} {
  func.func @ffn_kernel(%arg0: i32, %arg1: i32, %arg2: memref<16x128xf32, #tpu.memory_space<vmem>>, %arg3: memref<128x128xbf16, #tpu.memory_space<vmem>>, %arg4: memref<1x128xf32, #tpu.memory_space<vmem>>, %arg5: memref<128x128xbf16, #tpu.memory_space<vmem>>, %arg6: memref<1x128xf32, #tpu.memory_space<vmem>>, %arg7: memref<16x128xf32, #tpu.memory_space<vmem>>, %arg8: memref<16x128xf32, #tpu.memory_space<vmem>>) attributes {dimension_semantics = [#tpu.dimension_semantics<parallel>, #tpu.dimension_semantics<arbitrary>], iteration_bounds = array<i64: 1, 1>, scalar_prefetch = 0 : i64, scratch_operands = 1 : i64, tpu.core_type = #tpu.core_type<tc>, window_params = [{transform_indices = @transform_0, window_bounds = array<i64: 16, 128>}, {transform_indices = @transform_1, window_bounds = array<i64: 128, 128>}, {transform_indices = @transform_2, window_bounds = array<i64: 1, 128>}, {transform_indices = @transform_3, window_bounds = array<i64: 128, 128>}, {pipeline_mode = #tpu.pipeline_mode<synchronous>, transform_indices = @transform_4, window_bounds = array<i64: 1, 128>}, {transform_indices = @transform_5, window_bounds = array<i64: 16, 128>}]} {
    %c0_i32 = arith.constant 0 : i32
    %0 = arith.cmpi eq, %arg1, %c0_i32 : i32
    %1 = arith.extui %0 : i1 to i32
    %c0_i32_0 = arith.constant 0 : i32
    %2 = arith.cmpi ne, %1, %c0_i32_0 : i32
    scf.if %2 {
      %cst_16 = arith.constant 0.000000e+00 : f32
      %21 = vector.broadcast %cst_16 : f32 to vector<16x128xf32>
      %c0_17 = arith.constant 0 : index
      %c0_18 = arith.constant 0 : index
      %22 = vector.load %arg8[%c0_17, %c0_18] : memref<16x128xf32, #tpu.memory_space<vmem>>, vector<16x128xf32>
      tpu.vector_store %arg8[%c0_17, %c0_18], %21 {strides = array<i32>} : memref<16x128xf32, #tpu.memory_space<vmem>>, vector<16x128xf32>,
    } else {
    }
    %c0 = arith.constant 0 : index
    %c0_1 = arith.constant 0 : index
    %3 = vector.load %arg2[%c0, %c0_1] : memref<16x128xf32, #tpu.memory_space<vmem>>, vector<16x128xf32>
    %4 = arith.truncf %3 : vector<16x128xf32> to vector<16x128xbf16>
    %c0_2 = arith.constant 0 : index
    %c0_3 = arith.constant 0 : index
    %5 = vector.load %arg3[%c0_2, %c0_3] : memref<128x128xbf16, #tpu.memory_space<vmem>>, vector<128x128xbf16>
    %cst = arith.constant dense<0.000000e+00> : vector<16x128xf32>
    %6 = tpu.matmul %4, %5, %cst {dimension_numbers = #tpu.dot_dimension_numbers<[1], [0], [0], [1], [0, 0, 1, 1], [], []>} : vector<16x128xbf16>, vector<128x128xbf16>, vector<16x128xf32> -> vector<16x128xf32>
    %c0_4 = arith.constant 0 : index
    %c0_5 = arith.constant 0 : index
    %7 = vector.load %arg4[%c0_4, %c0_5] : memref<1x128xf32, #tpu.memory_space<vmem>>, vector<1x128xf32>
    %8 = vector.broadcast %7 : vector<1x128xf32> to vector<16x128xf32>
    %9 = arith.addf %6, %8 : vector<16x128xf32>
    %cst_6 = arith.constant 0.000000e+00 : f32
    %10 = vector.broadcast %cst_6 : f32 to vector<16x128xf32>
    %11 = arith.maximumf %9, %10 : vector<16x128xf32>
    %c0_7 = arith.constant 0 : index
    %c0_8 = arith.constant 0 : index
    %12 = vector.load %arg8[%c0_7, %c0_8] : memref<16x128xf32, #tpu.memory_space<vmem>>, vector<16x128xf32>
    %13 = arith.truncf %11 : vector<16x128xf32> to vector<16x128xbf16>
    %c0_9 = arith.constant 0 : index
    %c0_10 = arith.constant 0 : index
    %14 = vector.load %arg5[%c0_9, %c0_10] : memref<128x128xbf16, #tpu.memory_space<vmem>>, vector<128x128xbf16>
    %cst_11 = arith.constant dense<0.000000e+00> : vector<16x128xf32>
    %15 = tpu.matmul %13, %14, %cst_11 {dimension_numbers = #tpu.dot_dimension_numbers<[1], [0], [0], [1], [0, 0, 1, 1], [], []>} : vector<16x128xbf16>, vector<128x128xbf16>, vector<16x128xf32> -> vector<16x128xf32>
    %16 = arith.addf %12, %15 : vector<16x128xf32>
    %c0_12 = arith.constant 0 : index
    %c0_13 = arith.constant 0 : index
    %17 = vector.load %arg8[%c0_12, %c0_13] : memref<16x128xf32, #tpu.memory_space<vmem>>, vector<16x128xf32>
    tpu.vector_store %arg8[%c0_12, %c0_13], %16 {strides = array<i32>} : memref<16x128xf32, #tpu.memory_space<vmem>>, vector<16x128xf32>,
    %c0_i32_14 = arith.constant 0 : i32
    %18 = arith.cmpi eq, %arg1, %c0_i32_14 : i32
    %19 = arith.extui %18 : i1 to i32
    %c0_i32_15 = arith.constant 0 : i32
    %20 = arith.cmpi ne, %19, %c0_i32_15 : i32
    scf.if %20 {
      %c0_16 = arith.constant 0 : index
      %c0_17 = arith.constant 0 : index
      %21 = vector.load %arg8[%c0_16, %c0_17] : memref<16x128xf32, #tpu.memory_space<vmem>>, vector<16x128xf32>
      %c0_18 = arith.constant 0 : index
      %c0_19 = arith.constant 0 : index
      %22 = vector.load %arg6[%c0_18, %c0_19] : memref<1x128xf32, #tpu.memory_space<vmem>>, vector<1x128xf32>
      %23 = vector.broadcast %22 : vector<1x128xf32> to vector<16x128xf32>
      %24 = arith.addf %21, %23 : vector<16x128xf32>
      %c0_20 = arith.constant 0 : index
      %c0_21 = arith.constant 0 : index
      %25 = vector.load %arg7[%c0_20, %c0_21] : memref<16x128xf32, #tpu.memory_space<vmem>>, vector<16x128xf32>
      tpu.vector_store %arg7[%c0_20, %c0_21], %24 {strides = array<i32>} : memref<16x128xf32, #tpu.memory_space<vmem>>, vector<16x128xf32>,
    } else {
    }
    return
  }
  func.func @transform_0(%arg0: i32, %arg1: i32) -> (i32, i32) {
    %c0_i32 = arith.constant 0 : i32
    %c0_i32_0 = arith.constant 0 : i32
    return %arg0, %c0_i32 : i32, i32
  }
  func.func @transform_1(%arg0: i32, %arg1: i32) -> (i32, i32) {
    %c0_i32 = arith.constant 0 : i32
    %c0_i32_0 = arith.constant 0 : i32
    return %c0_i32, %arg1 : i32, i32
  }
  func.func @transform_2(%arg0: i32, %arg1: i32) -> (i32, i32) {
    %c0_i32 = arith.constant 0 : i32
    %c0_i32_0 = arith.constant 0 : i32
    return %c0_i32, %arg1 : i32, i32
  }
  func.func @transform_3(%arg0: i32, %arg1: i32) -> (i32, i32) {
    %c0_i32 = arith.constant 0 : i32
    %c0_i32_0 = arith.constant 0 : i32
    return %arg1, %c0_i32 : i32, i32
  }
  func.func @transform_4(%arg0: i32, %arg1: i32) -> (i32, i32) {
    %c0_i32 = arith.constant 0 : i32
    %c0_i32_0 = arith.constant 0 : i32
    %c0_i32_1 = arith.constant 0 : i32
    return %c0_i32, %c0_i32_0 : i32, i32
  }
  func.func @transform_5(%arg0: i32, %arg1: i32) -> (i32, i32) {
    %c0_i32 = arith.constant 0 : i32
    %c0_i32_0 = arith.constant 0 : i32
    return %arg0, %c0_i32 : i32, i32
  }
}

</mosaic_0001>

<bundles_post_ra>
// kernel: tpu_custom_call.1
= control target key start
LH: loop header
LB: loop body
LE: loop exit
PB: predicated region body
PF: predicated region fallthrough
CT: control target
= control target key end

     0   :  { %10 = vsyncpa [#allocation4], 0  ;;  %s634_s0 = inlined_call_operand.hbm [shape: f32[16,128], index: 0, kind: input, shape index: {}]   ;;  %s635_s1 = inlined_call_operand.hbm [shape: bf16[128,128], index: 1, kind: input, shape index: {}]   ;;  %s636_s2 = inlined_call_operand.vmem [shape: f32[1,128], index: 2, kind: input, shape index: {}]   ;;  %s637_s3 = inlined_call_operand.hbm [shape: bf16[128,128], index: 3, kind: input, shape index: {}]   ;;  %s638_s4 = inlined_call_operand.vmem [shape: f32[1,128], index: 4, kind: input, shape index: {}]   ;;  %s639_s5 = inlined_call_operand.hbm [shape: f32[16,128], index: 5, kind: output, shape index: {}]  }
   0x1   :  { %11 = vsyncpa [#allocation7], 0 }
   0x2   :  { %12 = vsyncpa [#allocation5], 0  ;;  %s528_s18 = smov [#allocation6]   ;;  %s434_s22 = scalar_lea.hbm %s635_s1, 1024 }
   0x3   :  { %s30_s19 = sshll.u32 %s528_s18, 4  ;;  %p435_p0 = scmp.ne.s32.totalorder %s635_s1, %s434_s22  ;;  %s31_s19 = int_to_ptr.vmem [resolvable:$true] %s30_s19 }
   0x4   :  { %p438_p1 = scmp.lt.u32.totalorder %s434_s22, %s635_s1 }
   0x6   :  { %p440_p2 = pnand %p438_p1, %p435_p0 }
   0x8   :  { %443 = shalt.err (!%p440_p2)
}
   0x9   :  { %s444_s27 = scalar_lea.vmem %s31_s19, 1024  ;;  %p449_p4 = scmp.lt.s32.totalorder %s31_s19, %s31_s19 }
   0xa   :  { %p445_p3 = scmp.ne.s32.totalorder %s31_s19, %s444_s27  ;;  %p450_p5 = scmp.lt.s32.totalorder %s444_s27, %s444_s27 }
   0xc   :  { %p451_p6 = por %p450_p5, %p449_p4 }
   0xe   :  { %p452_p7 = pnand %p451_p6, %p445_p3 }
  0x10   :  { %455 = shalt.err (!%p452_p7)
}
  0x11   :  { %s529_s28 = smov 64   ;;  %s530_s29 = smov 4  }
  0x12   :  { %36 = dma.hbm_to_vmem [thread:$0]  %s635_s1, 1024, %s31_s19, [#allocation7], %s529_s28, %s529_s28, %s530_s29  }
  0x13   :  { %s531_s7 = smov [#allocation3]   ;;  %s456_s11 = scalar_lea.hbm %s634_s0, 256 }
  0x14   :  { %s18_s8 = sshll.u32 %s531_s7, 4  ;;  %p457_p8 = scmp.ne.s32.totalorder %s634_s0, %s456_s11  ;;  %s19_s8 = int_to_ptr.vmem [resolvable:$true] %s18_s8 }
  0x15   :  { %p460_p9 = scmp.lt.u32.totalorder %s456_s11, %s634_s0 }
  0x17   :  { %p462_p10 = pnand %p460_p9, %p457_p8 }
  0x19   :  { %465 = shalt.err (!%p462_p10)
}
  0x1a   :  { %s466_s16 = scalar_lea.vmem %s19_s8, 256  ;;  %p471_p12 = scmp.lt.s32.totalorder %s19_s8, %s19_s8 }
  0x1b   :  { %p467_p11 = scmp.ne.s32.totalorder %s19_s8, %s466_s16  ;;  %p472_p13 = scmp.lt.s32.totalorder %s466_s16, %s466_s16 }
  0x1d   :  { %p473_p0 = por %p472_p13, %p471_p12 }
  0x1f   :  { %p474_p1 = pnand %p473_p0, %p467_p11 }
  0x21   :  { %477 = shalt.err (!%p474_p1)
}
  0x22   :  { %s532_s1 = smov 128   ;;  %s533_s17 = smov 8  }
  0x23   :  { %24 = dma.hbm_to_vmem [thread:$0]  %s634_s0, 256, %s19_s8, [#allocation4], %s532_s1, %s532_s1, %s533_s17  }
  0x24   :  { %s534_s20 = smov [#allocation8]   ;;  %s478_s24 = scalar_lea.hbm %s637_s3, 1024 }
  0x25   :  { %s44_s21 = sshll.u32 %s534_s20, 4  ;;  %p479_p2 = scmp.ne.s32.totalorder %s637_s3, %s478_s24  ;;  %s45_s21 = int_to_ptr.vmem [resolvable:$true] %s44_s21 }
  0x26   :  { %p482_p3 = scmp.lt.u32.totalorder %s478_s24, %s637_s3 }
  0x28   :  { %p484_p4 = pnand %p482_p3, %p479_p2 }
  0x2a   :  { %487 = shalt.err (!%p484_p4)
}
  0x2b   :  { %s488_s6 = scalar_lea.vmem %s45_s21, 1024  ;;  %p493_p6 = scmp.lt.s32.totalorder %s45_s21, %s45_s21 }
  0x2c   :  { %p489_p5 = scmp.ne.s32.totalorder %s45_s21, %s488_s6  ;;  %p494_p7 = scmp.lt.s32.totalorder %s488_s6, %s488_s6 }
  0x2e   :  { %p495_p8 = por %p494_p7, %p493_p6 }
  0x30   :  { %p496_p9 = pnand %p495_p8, %p489_p5 }
  0x32   :  { %499 = shalt.err (!%p496_p9)
}
  0x33   :  { %50 = dma.hbm_to_vmem [thread:$0]  %s637_s3, 1024, %s45_s21, [#allocation7], %s529_s28, %s529_s28, %s530_s29  }
  0x34   :  { %522 = dma.done.wait [#allocation4], 256  }
  0x35   :  { %523 = vsyncadd [#allocation4], 4294967040 }
  0x36   :  { %524 = dma.done.wait [#allocation7], 2048  }
  0x37   :  { %525 = vsyncadd [#allocation7], 4294965248  ;;  %v535_v0 = vmov 0.0   ;;  %vm536_vm0 = vmmov 0   ;;  %v418_v1 = vld [vmem:[#allocation6] sm:$0xff]   ;;  %v419_v2 = vld [vmem:[#allocation6 + $0x8] sm:$0xff]  }
  0x38   :  { %368 = vmatprep.subr.bf16.mxu0 %v535_v0  ;;  %384 = vmatprep.mubr.msk.bf16.mxu0 %vm536_vm0, %v535_v0  ;;  %v420_v3 = vld [vmem:[#allocation6 + $0x10] sm:$0xff]   ;;  %v426_v4 = vld [vmem:[#allocation8] sm:$0xff]   ;;  %v421_v5 = vld [vmem:[#allocation6 + $0x18] sm:$0xff]   ;;  %s537_s9 = smov [#allocation9]  }
  0x39   :  { %388 = vmatprep.subr.bf16.mxu1 %v535_v0  ;;  %404 = vmatprep.mubr.msk.bf16.mxu1 %vm536_vm0, %v535_v0  ;;  %v427_v6 = vld [vmem:[#allocation8 + $0x8] sm:$0xff]   ;;  %v422_v7 = vld [vmem:[#allocation6 + $0x20] sm:$0xff]   ;;  %v428_v8 = vld [vmem:[#allocation8 + $0x10] sm:$0xff]   ;;  %s319_s10 = sshll.u32 %s537_s9, 4  ;;  %s320_s10 = int_to_ptr.vmem [resolvable:$true] %s319_s10 }
  0x3a   :  { %369 = vmatpush3.bf16.msra.mxu0 %v418_v1  ;;  %389 = vmatpush3.bf16.msra.mxu1 %v426_v4  ;;  %v423_v9 = vld [vmem:[#allocation6 + $0x28] sm:$0xff]   ;;  %v429_v10 = vld [vmem:[#allocation8 + $0x18] sm:$0xff]   ;;  %v424_v11 = vld [vmem:[#allocation6 + $0x30] sm:$0xff]   ;;  %p505_p11 = scmp.lt.s32.totalorder %s320_s10, %s320_s10 }
  0x3b   :  { %370 = vmatprep.subr.bf16.mxu0 %v535_v0  ;;  %390 = vmatprep.subr.bf16.mxu1 %v535_v0  ;;  %v430_v12 = vld [vmem:[#allocation8 + $0x20] sm:$0xff]   ;;  %v425_v13 = vld [vmem:[#allocation6 + $0x38] sm:$0xff]   ;;  %v69_v14 = vld [vmem:[#allocation3] sm:$0xff] }
  0x3c   :  { %v70_v15 = vld [vmem:[#allocation3 + $0x8] sm:$0xff]  ;;  %v431_v16 = vld [vmem:[#allocation8 + $0x28] sm:$0xff]   ;;  %v432_v18 = vld [vmem:[#allocation8 + $0x30] sm:$0xff]  }
  0x3d   :  { %v71_v17 = vpack.c.bf16 %v70_v15, %v69_v14  ;;  %v433_v19 = vld [vmem:[#allocation8 + $0x38] sm:$0xff]   ;;  %v332_v20 = vld [vmem:[%s636_s2] ss:$0 sm:$0xff]  ;;  %s500_s2 = scalar_lea.vmem %s320_s10, 256 }
  0x3e   :  { %371 = vmatpush3.bf16.msra.mxu0 %v419_v2  ;;  %391 = vmatpush3.bf16.msra.mxu1 %v427_v6  ;;  %v349_v30 = vld [vmem:[%s638_s4] ss:$0 sm:$0xff]  ;;  %p501_p10 = scmp.ne.s32.totalorder %s320_s10, %s500_s2  ;;  %p506_p12 = scmp.lt.s32.totalorder %s500_s2, %s500_s2 }
  0x3f   :  { %372 = vmatprep.subr.bf16.mxu0 %v535_v0  ;;  %392 = vmatprep.subr.bf16.mxu1 %v535_v0 }
  0x40   :  { %p507_p13 = por %p506_p12, %p505_p11 }
  0x42   :  { %373 = vmatpush3.bf16.msra.mxu0 %v420_v3  ;;  %393 = vmatpush3.bf16.msra.mxu1 %v428_v8  ;;  %p508_p0 = pnand %p507_p13, %p501_p10 }
  0x43   :  { %374 = vmatprep.subr.bf16.mxu0 %v535_v0  ;;  %394 = vmatprep.subr.bf16.mxu1 %v535_v0 }
  0x46   :  { %375 = vmatpush3.bf16.msra.mxu0 %v421_v5  ;;  %395 = vmatpush3.bf16.msra.mxu1 %v429_v10 }
  0x47   :  { %376 = vmatprep.subr.bf16.mxu0 %v535_v0  ;;  %396 = vmatprep.subr.bf16.mxu1 %v535_v0 }
  0x4a   :  { %377 = vmatpush3.bf16.msra.mxu0 %v422_v7  ;;  %397 = vmatpush3.bf16.msra.mxu1 %v430_v12 }
  0x4b   :  { %378 = vmatprep.subr.bf16.mxu0 %v535_v0  ;;  %398 = vmatprep.subr.bf16.mxu1 %v535_v0 }
  0x4e   :  { %379 = vmatpush3.bf16.msra.mxu0 %v423_v9  ;;  %399 = vmatpush3.bf16.msra.mxu1 %v431_v16 }
  0x4f   :  { %380 = vmatprep.subr.bf16.mxu0 %v535_v0  ;;  %400 = vmatprep.subr.bf16.mxu1 %v535_v0 }
  0x52   :  { %381 = vmatpush3.bf16.msra.mxu0 %v424_v11  ;;  %401 = vmatpush3.bf16.msra.mxu1 %v432_v18 }
  0x53   :  { %382 = vmatprep.subr.bf16.mxu0 %v535_v0  ;;  %402 = vmatprep.subr.bf16.mxu1 %v535_v0 }
  0x56   :  { %383 = vmatpush3.bf16.msra.mxu0 %v425_v13  ;;  %403 = vmatpush3.bf16.msra.mxu1 %v433_v19 }
  0x59   :  { %385 = vmatmul.mubr.bf16.vlgmr.msra.gmra.mrb[0].mxu0 %v71_v17 }
 0x12c   :  { %v177_v21 = vpop.f32.mrb[0].mxu0 }
 0x12d   :  { %v178_v22 = vadd.f32 %v332_v20, %v177_v21  ;;  %v386_v23 = vpop.f32.mrb[1].mxu0 }
 0x12e   :  { %v180_v24 = vpop.f32.mrb[2].mxu0 }
 0x12f   :  { %v181_v25 = vadd.f32 %v332_v20, %v180_v24  ;;  %v387_v26 = vpop.f32.mrb[3].mxu0  ;;  %v184_v27 = vmax.f32 %v178_v22, 0.0 }
 0x131   :  { %v185_v28 = vmax.f32 %v181_v25, 0.0 }
 0x133   :  { %v188_v29 = vpack.c.bf16 %v185_v28, %v184_v27 }
 0x135   :  { %405 = vmatmul.mubr.bf16.vlgmr.msra.gmra.mrb[0].mxu1 %v188_v29 }
 0x208   :  { %v287_v31 = vpop.f32.mrb[0].mxu1 }
 0x209   :  { %v310_v32 = vadd.f32 %v349_v30, %v287_v31  ;;  %v406_v33 = vpop.f32.mrb[1].mxu1 }
 0x20a   :  { %v290_v34 = vpop.f32.mrb[2].mxu1 }
 0x20b   :  { %312 = vst [vmem:[#allocation9] sm:$0xff] %v310_v32  ;;  %v311_v35 = vadd.f32 %v349_v30, %v290_v34  ;;  %v407_v36 = vpop.f32.mrb[3].mxu1 }
 0x20d   :  { %313 = vst [vmem:[#allocation9 + $0x8] sm:$0xff] %v311_v35 }
 0x20e   :  { %511 = shalt.err (!%p508_p0)
}
 0x20f   :  { %s512_s12 = scalar_lea.hbm %s639_s5, 256 }
 0x210   :  { %p513_p1 = scmp.ne.s32.totalorder %s639_s5, %s512_s12  ;;  %p516_p2 = scmp.lt.u32.totalorder %s512_s12, %s639_s5 }
 0x212   :  { %p518_p3 = pnand %p516_p2, %p513_p1 }
 0x214   :  { %521 = shalt.err (!%p518_p3)
}
 0x215   :  { %325 = dma.vmem_to_hbm [thread:$0]  %s320_s10, 256, %s639_s5, [#allocation5], %s532_s1, %s532_s1, %s533_s17  }
 0x216   :  { %526 = dma.done.wait [#allocation5], 256  }
 0x217   :  { %527 = vsyncadd [#allocation5], 4294967040 }
 0x218   :  { %329 = vsyncpa [#allocation4], 1 }
 0x219   :  { %330 = vsyncpa [#allocation7], 1 }
 0x21a   :  { %331 = vsyncpa [#allocation5], 1 }

</bundles_post_ra>
